<compile_context>
chip_gen: v6e
topology: v6e:2x2x1
jax: 0.10.0
libtpu: 0.0.40
codegen_flags: <defaults>
</compile_context>

<pallas_src>
import functools
import math

import jax
import jax.numpy as jnp
from jax import lax
from jax.experimental import pallas as pl
from jax.experimental.pallas import tpu as pltpu


# --------------------------------------------------------------------------- reference table
def build_pe(d_model: int, max_len: int = 80) -> jnp.ndarray:
    """Reproduce the PyTorch __init__ pe buffer (float32). Used only for checking."""
    a = jnp.arange(0, max_len, dtype=jnp.float32).reshape(-1, 1)   # (max_len, 1)
    b = jnp.arange(0, d_model, dtype=jnp.float32)                  # (d_model,)
    pe = a / (10000.0 ** (2.0 * b / float(d_model)))               # (max_len, d_model)
    col = jnp.arange(d_model)
    pe = jnp.where((col % 2) == 0, jnp.sin(pe), jnp.cos(pe))
    return pe.astype(jnp.float32)


# --------------------------------------------------------------------------- kernel
def _add_pe_kernel(x_ref, o_ref, *, d_model, pos_per_row):
    """out = x + pe, with pe generated in-kernel.

    Works for both layouts:
      * natural:  lanes == d_model, pos_per_row == 1
      * flat:     lanes == lcm(d_model, 128), pos_per_row == lanes // d_model
    pe[pos, col] = sin(pos / 10000**(2*col/d_model) + (col % 2) * pi/2)
    (even col -> sin, odd col -> cos of the same per-column frequency, matching the
     reference module).
    """
    tile_rows, lanes = x_ref.shape

    # ---- lane-only (row-invariant) factors: computed once per tile, shape (1, lanes) ----
    lane = lax.broadcasted_iota(jnp.int32, (1, lanes), 1).astype(jnp.float32)
    inv_d = jnp.float32(1.0 / float(d_model))
    posoff = jnp.floor(lane * inv_d)                       # lane // d_model  (exact in f32)
    col = lane - posoff * jnp.float32(d_model)             # lane %  d_model
    is_odd = col - 2.0 * jnp.floor(col * 0.5)              # 0.0 even col, 1.0 odd col
    scale = jnp.float32(-2.0 * math.log(10000.0) / float(d_model))
    inv_freq = jnp.exp(col * scale)                        # 1 / 10000**(2*col/d_model)
    base = posoff * inv_freq + is_odd * jnp.float32(math.pi / 2.0)

    # ---- per-element path: outer-product broadcast, one mul + one add + one sin ----
    row0 = (pl.program_id(0) * tile_rows).astype(jnp.float32)
    row = lax.broadcasted_iota(jnp.int32, (tile_rows, 1), 0).astype(jnp.float32) + row0
    row_pos = row * jnp.float32(pos_per_row)               # (tile_rows, 1) position of lane 0
    angle = row_pos * inv_freq + base                      # (tile_rows, lanes)
    pe = jnp.sin(angle)                                    # cos folded in via +pi/2 phase
    o_ref[...] = (x_ref[...].astype(jnp.float32) + pe).astype(o_ref.dtype)


# --------------------------------------------------------------------------- tiling helper
def _pick_tile_rows(total_rows, lane_width, dtype, budget_bytes=4 << 20):
    """Row tile choice:
       * one buffer <= ~4 MiB (2 streams x 2 buffers = 16 MiB, inside the explicit
         32 MiB vmem_limit_bytes on every generation),
       * rows aligned to the dtype's sublane packing (8 f32 / 16 bf16 / 32 int8),
       * when the array spans multiple tiles, an even number of grid steps so the
         'parallel' grid balances across v7x's two TensorCores."""
    itemsize = jnp.dtype(dtype).itemsize
    align = max(8, 32 // itemsize)
    max_rows = max(align, (budget_bytes // (lane_width * itemsize)) // align * align)
    if total_rows <= max_rows:
        return total_rows                                   # single full-extent tile
    n_tiles = -(-total_rows // max_rows)
    if n_tiles % 2:
        n_tiles += 1                                        # even grid for v7x's 2 TCs
    tr = -(-total_rows // n_tiles)
    return max(align, -(-tr // align) * align)


# --------------------------------------------------------------------------- pallas_call wrapper
def _call_add_pe(x2d, d_model, pos_per_row):
    n_rows, lanes = x2d.shape
    tr = _pick_tile_rows(n_rows, lanes, x2d.dtype)
    kernel = functools.partial(_add_pe_kernel, d_model=d_model, pos_per_row=pos_per_row)
    return pl.pallas_call(
        kernel,
        out_shape=jax.ShapeDtypeStruct((n_rows, lanes), x2d.dtype),
        grid_spec=pltpu.PrefetchScalarGridSpec(
            num_scalar_prefetch=0,
            grid=(pl.cdiv(n_rows, tr),),
            in_specs=[pl.BlockSpec((tr, lanes), lambda i: (i, 0))],
            out_specs=pl.BlockSpec((tr, lanes), lambda i: (i, 0)),
        ),
        compiler_params=pltpu.CompilerParams(
            dimension_semantics=("parallel",),
            vmem_limit_bytes=32 << 20),
    )(x2d)


def positional_encoder(x: jnp.ndarray, max_len: int = 80) -> jnp.ndarray:
    """Forward of PositionalEncoder: x (seq_len, d_model) -> x + pe[:seq_len].
    (The reference module has no sqrt(d_model) scaling and no dropout.)"""
    seq_len, d_model = x.shape
    if seq_len > max_len:
        raise ValueError(
            f"seq_len={seq_len} exceeds max_len={max_len}: the reference module's pe "
            f"table only covers max_len positions.")

    if d_model % 128 != 0:
        # Lane-dense flattened view: L = lcm(d_model, 128) lanes per row.
        g = math.gcd(d_model, 128)
        lanes = d_model * (128 // g)
        ppr = lanes // d_model                               # full positions per row
        if seq_len > 0 and seq_len % ppr == 0:
            n_rows = seq_len // ppr
            out = _call_add_pe(x.reshape(n_rows, lanes), d_model, ppr)
            return out.reshape(seq_len, d_model)

    # Natural layout: rows = positions, lanes = d_model (full-extent last dim).
    return _call_add_pe(x, d_model, 1)


# --------------------------------------------------------------------------- demo / check
if __name__ == "__main__":
    max_len = 80
    key = jax.random.PRNGKey(0)

    # (seq_len, d_model): lane-dense pow2 path, lane-dense non-pow2 path (L=384),
    # and natural 128-lane path.
    cases = [(8, 32), (24, 48), (16, 128)]
    out = None
    for idx, (seq_len, d_model) in enumerate(cases):
        k = jax.random.fold_in(key, idx)
        x = jax.random.normal(k, (seq_len, d_model), dtype=jnp.float32)
        out = jax.block_until_ready(positional_encoder(x, max_len=max_len))
        ref = x + build_pe(d_model, max_len)[:seq_len]
        assert out.shape == (seq_len, d_model)
        err = float(jnp.max(jnp.abs(out - ref)))
        assert err < 2e-4, (seq_len, d_model, err)

    print("KERNEL_OK")
</pallas_src>

<mosaic_0001>
module attributes {stable_mosaic.version = 11 : i64} {
  func.func @_add_pe_kernel(%arg0: i32, %arg1: memref<2x128xf32, #tpu.memory_space<vmem>>, %arg2: memref<2x128xf32, #tpu.memory_space<vmem>>) attributes {dimension_semantics = [#tpu.dimension_semantics<parallel>], iteration_bounds = array<i64: 1>, scalar_prefetch = 0 : i64, scratch_operands = 0 : i64, tpu.core_type = #tpu.core_type<tc>, window_params = [{transform_indices = @transform_0, window_bounds = array<i64: 2, 128>}, {transform_indices = @transform_1, window_bounds = array<i64: 2, 128>}]} {
    %0 = tpu.iota {dimensions = array<i32: 1>} : vector<1x128xi32>
    %1 = arith.sitofp %0 : vector<1x128xi32> to vector<1x128xf32>
    %cst = arith.constant 3.125000e-02 : f32
    %2 = vector.broadcast %cst : f32 to vector<1x128xf32>
    %3 = arith.mulf %1, %2 : vector<1x128xf32>
    %4 = math.floor %3 : vector<1x128xf32>
    %cst_0 = arith.constant 3.200000e+01 : f32
    %5 = vector.broadcast %cst_0 : f32 to vector<1x128xf32>
    %6 = arith.mulf %4, %5 : vector<1x128xf32>
    %7 = arith.subf %1, %6 : vector<1x128xf32>
    %cst_1 = arith.constant 5.000000e-01 : f32
    %8 = vector.broadcast %cst_1 : f32 to vector<1x128xf32>
    %9 = arith.mulf %7, %8 : vector<1x128xf32>
    %10 = math.floor %9 : vector<1x128xf32>
    %cst_2 = arith.constant 2.000000e+00 : f32
    %11 = vector.broadcast %cst_2 : f32 to vector<1x128xf32>
    %12 = arith.mulf %11, %10 : vector<1x128xf32>
    %13 = arith.subf %7, %12 : vector<1x128xf32>
    %cst_3 = arith.constant -0.575646281 : f32
    %14 = vector.broadcast %cst_3 : f32 to vector<1x128xf32>
    %15 = arith.mulf %7, %14 : vector<1x128xf32>
    %16 = math.exp %15 : vector<1x128xf32>
    %17 = arith.mulf %4, %16 : vector<1x128xf32>
    %cst_4 = arith.constant 1.57079637 : f32
    %18 = vector.broadcast %cst_4 : f32 to vector<1x128xf32>
    %19 = arith.mulf %13, %18 : vector<1x128xf32>
    %20 = arith.addf %17, %19 : vector<1x128xf32>
    %c2_i32 = arith.constant 2 : i32
    %21 = arith.muli %arg0, %c2_i32 : i32
    %22 = arith.sitofp %21 : i32 to f32
    %23 = tpu.iota {dimensions = array<i32: 0>} : vector<2x1xi32>
    %24 = arith.sitofp %23 : vector<2x1xi32> to vector<2x1xf32>
    %25 = vector.broadcast %22 : f32 to vector<2x1xf32>
    %26 = arith.addf %24, %25 : vector<2x1xf32>
    %cst_5 = arith.constant 4.000000e+00 : f32
    %27 = vector.broadcast %cst_5 : f32 to vector<2x1xf32>
    %28 = arith.mulf %26, %27 : vector<2x1xf32>
    %29 = vector.broadcast %28 : vector<2x1xf32> to vector<2x128xf32>
    %30 = vector.broadcast %16 : vector<1x128xf32> to vector<2x128xf32>
    %31 = arith.mulf %29, %30 : vector<2x128xf32>
    %32 = vector.broadcast %20 : vector<1x128xf32> to vector<2x128xf32>
    %33 = arith.addf %31, %32 : vector<2x128xf32>
    %34 = math.sin %33 : vector<2x128xf32>
    %c0 = arith.constant 0 : index
    %c0_6 = arith.constant 0 : index
    %35 = vector.load %arg1[%c0, %c0_6] : memref<2x128xf32, #tpu.memory_space<vmem>>, vector<2x128xf32>
    %36 = arith.addf %35, %34 : vector<2x128xf32>
    %c0_7 = arith.constant 0 : index
    %c0_8 = arith.constant 0 : index
    %37 = vector.load %arg2[%c0_7, %c0_8] : memref<2x128xf32, #tpu.memory_space<vmem>>, vector<2x128xf32>
    tpu.vector_store %arg2[%c0_7, %c0_8], %36 {strides = array<i32>} : memref<2x128xf32, #tpu.memory_space<vmem>>, vector<2x128xf32>,
    return
  }
  func.func @transform_0(%arg0: i32) -> (i32, i32) {
    %c0_i32 = arith.constant 0 : i32
    %c0_i32_0 = arith.constant 0 : i32
    return %arg0, %c0_i32 : i32, i32
  }
  func.func @transform_1(%arg0: i32) -> (i32, i32) {
    %c0_i32 = arith.constant 0 : i32
    %c0_i32_0 = arith.constant 0 : i32
    return %arg0, %c0_i32 : i32, i32
  }
}

</mosaic_0001>

<bundles_post_ra>
// kernel: tpu_custom_call.1
= control target key start
LH: loop header
LB: loop body
LE: loop exit
PB: predicated region body
PF: predicated region fallthrough
CT: control target
= control target key end

     0   :  { %6 = vsyncpa [#allocation3], 0  ;;  %s281_s0 = inlined_call_operand.hbm [shape: f32[2,128], index: 0, kind: input, shape index: {}]   ;;  %s282_s1 = inlined_call_operand.hbm [shape: f32[2,128], index: 1, kind: output, shape index: {}]  }
   0x1   :  { %7 = vsyncpa [#allocation4], 0  ;;  %s236_s6 = smov [#allocation2]  }
   0x2   :  { %s14_s7 = sshll.u32 %s236_s6, 4  ;;  %s15_s7 = int_to_ptr.vmem [resolvable:$true] %s14_s7 }
   0x3   :  { %s200_s8 = scalar_lea.vmem %s15_s7, 32  ;;  %p205_p1 = scmp.lt.s32.totalorder %s15_s7, %s15_s7 }
   0x4   :  { %p201_p0 = scmp.ne.s32.totalorder %s15_s7, %s200_s8  ;;  %p206_p2 = scmp.lt.s32.totalorder %s200_s8, %s200_s8 }
   0x6   :  { %p207_p3 = por %p206_p2, %p205_p1 }
   0x8   :  { %p208_p4 = pnand %p207_p3, %p201_p0 }
   0xa   :  { %211 = shalt.err (!%p208_p4)
}
   0xb   :  { %17 = dma.hbm_to_vmem [thread:$0]  %s281_s0, 32, %s15_s7, [#allocation3]  }
   0xc   :  { %232 = dma.done.wait [#allocation3], 32  }
   0xd   :  { %233 = vsyncadd [#allocation3], 4294967264  ;;  %v21_v0 = vlaneseq  ;;  %v237_v33 = vmov 683565275   ;;  %v238_v35 = vmov 2475754826  }
   0xe   :  { %v239_v37 = vmov 2131351028   ;;  %v240_v39 = vmov 2102212464   ;;  %v241_v41 = vmov 920167782  }
   0xf   :  { %v22_v1 = vand.u32 127, %v21_v0  ;;  %v41_v11 = vshrl.u32 %v21_v0, 7  ;;  %v242_v48 = vmov 1326507024   ;;  %s243_s0 = smov [#allocation5]  }
  0x10   :  { %s161_s11 = sshll.u32 %s243_s0, 4  ;;  %s162_s11 = int_to_ptr.vmem [resolvable:$true] %s161_s11 }
  0x11   :  { %v23_v2 = vcvt.s32.f32 %v22_v1  ;;  %v42_v13 = vcvt.s32.f32 %v41_v11  ;;  %s212_s12 = scalar_lea.vmem %s162_s11, 32  ;;  %p217_p6 = scmp.lt.s32.totalorder %s162_s11, %s162_s11 }
  0x12   :  { %p213_p5 = scmp.ne.s32.totalorder %s162_s11, %s212_s12  ;;  %p218_p7 = scmp.lt.s32.totalorder %s212_s12, %s212_s12 }
  0x13   :  { %v24_v3 = vmul.f32 0.03125, %v23_v2  ;;  %v45_v15 = vmul.f32 4.0, %v42_v13 }
  0x14   :  { %p219_p8 = por %p218_p7, %p217_p6 }
  0x15   :  { %v25_v4 = vfloor.f32 %v24_v3 }
  0x16   :  { %p220_p9 = pnand %p219_p8, %p213_p5 }
  0x17   :  { %v26_v5 = vmul.f32 32.0, %v25_v4 }
  0x19   :  { %v27_v6 = vsub.f32 %v23_v2, %v26_v5 }
  0x1b   :  { %v28_v7 = vmul.f32 0.5, %v27_v6  ;;  %v32_v8 = vmul.f32 -0.5756463, %v27_v6 }
  0x1d   :  { %v33_v9 = vmul.f32 1.442695, %v32_v8  ;;  %v29_v10 = vfloor.f32 %v28_v7 }
  0x1f   :  { %186 = vpow2.f32 %v33_v9  ;;  %v30_v12 = vmul.f32 2.0, %v29_v10 }
  0x21   :  { %v31_v14 = vsub.f32 %v27_v6, %v30_v12 }
  0x23   :  { %v36_v16 = vmul.f32 1.5707964, %v31_v14 }
  0x2c   :  { %v187_v17 = vpop.eup %186 }
  0x2d   :  { %v35_v18 = vmul.f32 %v187_v17, %v25_v4  ;;  %v46_v19 = vmul.f32 %v187_v17, %v45_v15 }
  0x2f   :  { %v37_v20 = vadd.f32 %v36_v16, %v35_v18 }
  0x31   :  { %v257_v21 = vadd.f32 %v46_v19, %v37_v20 }
  0x33   :  { %v51_v22 = vand.u32 2139095040, %v257_v21  ;;  %v48_v24 = vand.u32 2147483647, %v257_v21  ;;  %vm50_vm7 = vcmp.lt.s32.totalorder %v257_v21, 0  ;;  %vm140_vm12 = vweird.f32 %v257_v21 }
  0x35   :  { %v52_v23 = vshrl.u32 %v51_v22, 23  ;;  %v55_v27 = vand.u32 8388607, %v48_v24  ;;  %vm49_vm8 = vcmp.le.f32.partialorder %v48_v24, 0.7853982 }
  0x37   :  { %v170_v25 = vadd.s32 4294967169, %v52_v23  ;;  %v56_v30 = vor.u32 8388608, %v55_v27 }
  0x39   :  { %v58_v26 = vadd.s32 1, %v170_v25  ;;  %v96_v50 = vshll.u32 %v56_v30, 8 }
  0x3b   :  { %vm59_vm0 = vcmp.gt.s32.totalorder %v58_v26, 0 }
  0x3c   :  { %v60_v28 = vsel %vm59_vm0, %v58_v26, 0 }
  0x3d   :  { %v62_v29 = vand.u32 31, %v60_v28  ;;  %v61_v31 = vshrl.u32 %v60_v28, 5 }
  0x3f   :  { %v63_v32 = vsub.s32 32, %v62_v29  ;;  %v65_v34 = vshll.u32 %v237_v33, %v62_v29  ;;  %v68_v36 = vshll.u32 %v238_v35, %v62_v29  ;;  %v71_v38 = vshll.u32 %v239_v37, %v62_v29 }
  0x40   :  { %v74_v40 = vshll.u32 %v240_v39, %v62_v29  ;;  %v77_v42 = vshll.u32 %v241_v41, %v62_v29  ;;  %vm80_vm1 = vcmp.lt.s32.totalorder %v61_v31, 1  ;;  %vm83_vm2 = vcmp.lt.s32.totalorder %v61_v31, 4 }
  0x41   :  { %v64_v43 = vshrl.u32 %v237_v33, %v63_v32  ;;  %v66_v44 = vshrl.u32 %v238_v35, %v63_v32  ;;  %v69_v45 = vshrl.u32 %v239_v37, %v63_v32  ;;  %v72_v46 = vshrl.u32 %v240_v39, %v63_v32 }
  0x42   :  { %v75_v47 = vshrl.u32 %v241_v41, %v63_v32  ;;  %v78_v49 = vshrl.u32 %v242_v48, %v63_v32  ;;  %vm81_vm3 = vcmp.lt.s32.totalorder %v61_v31, 2  ;;  %vm82_vm4 = vcmp.lt.s32.totalorder %v61_v31, 3  ;;  %v152_v48 = vld [vmem:[#allocation2] sm:$0x3] }
  0x43   :  { %v67_v51 = vor.u32 %v66_v44, %v65_v34  ;;  %v70_v52 = vor.u32 %v69_v45, %v68_v36  ;;  %v73_v53 = vor.u32 %v72_v46, %v71_v38 }
  0x44   :  { %v76_v54 = vor.u32 %v75_v47, %v74_v40  ;;  %v79_v55 = vor.u32 %v78_v49, %v77_v42 }
  0x45   :  { %v84_v56 = vsel %vm80_vm1, %v64_v43, %v67_v51  ;;  %v85_v57 = vsel %vm83_vm2, %v73_v53, 2102212464  ;;  %v88_v58 = vsel %vm80_vm1, %v67_v51, %v70_v52  ;;  %v92_v59 = vsel %vm80_vm1, %v70_v52, %v73_v53 }
  0x46   :  { %v86_v60 = vsel %vm82_vm4, %v70_v52, %v85_v57  ;;  %v89_v61 = vsel %vm83_vm2, %v76_v54, 920167782  ;;  %v93_v62 = vsel %vm83_vm2, %v79_v55, 1326507024 }
  0x47   :  { %v90_v63 = vsel %vm82_vm4, %v73_v53, %v89_v61  ;;  %v94_v0 = vsel %vm82_vm4, %v76_v54, %v93_v62  ;;  %v87_v1 = vsel %vm81_vm3, %v84_v56, %v86_v60 }
  0x48   :  { %v91_v2 = vsel %vm81_vm3, %v88_v58, %v90_v63  ;;  %v95_v3 = vsel %vm81_vm3, %v92_v59, %v94_v0  ;;  %v103_v8 = vmul.u32 %v96_v50, %v87_v1 }
  0x49   :  { %v263_v4 = vmul.u32.u64.low %v96_v50, %v95_v3  ;;  %v264_v5 = vmul.u32.u64.high %v96_v50, %v95_v3, %v263_v4  ;;  %v266_v6 = vmul.u32.u64.low %v96_v50, %v91_v2  ;;  %v267_v7 = vmul.u32.u64.high %v96_v50, %v91_v2, %v266_v6 }
  0x4b   :  { %vm105_vm5 = vc.u32 %v264_v5, %v266_v6  ;;  %v106_v9 = vadd.s32 1, %v267_v7  ;;  %v104_v20 = vadd.s32 %v266_v6, %v264_v5 }
  0x4d   :  { %v107_v10 = vsel %vm105_vm5, %v106_v9, %v267_v7 }
  0x4e   :  { %v108_v11 = vadd.s32 %v107_v10, %v103_v8 }
  0x50   :  { %v109_v12 = vadd.s32 536870912, %v108_v11 }
  0x52   :  { %v110_v13 = vshrl.u32 %v109_v12, 30 }
  0x54   :  { %v111_v14 = vshll.u32 %v110_v13, 30  ;;  %v134_v35 = vsub.s32 4, %v110_v13 }
  0x56   :  { %v112_v15 = vsub.s32 %v108_v11, %v111_v14  ;;  %v135_v38 = vsel %vm50_vm7, %v134_v35, %v110_v13 }
  0x57   :  { %v137_v40 = vsel %vm49_vm8, 0, %v135_v38 }
  0x58   :  { %v114_v16 = vsub.s32 0, %v112_v15  ;;  %v141_v41 = vadd.s32 3, %v137_v40 }
  0x5a   :  { %v171_v17 = vmin.u32 %v114_v16, %v112_v15  ;;  %v142_v42 = vand.u32 3, %v141_v41 }
  0x5c   :  { %v116_v18 = vclz %v171_v17  ;;  %vm147_vm9 = vcmp.eq.s32.totalorder %v142_v42, 2  ;;  %vm144_vm10 = vcmp.eq.s32.totalorder %v142_v42, 0  ;;  %vm143_vm11 = vcmp.lt.s32.totalorder %v142_v42, 2 }
  0x5e   :  { %v172_v19 = vadd.s32 4294967294, %v116_v18 }
  0x60   :  { %vm173_vm6 = vcmp.lt.s32.totalorder %v172_v19, 0 }
  0x61   :  { %v119_v22 = vsel %vm173_vm6, 0, %v172_v19 }
  0x62   :  { %v120_v23 = vsub.s32 32, %v119_v22  ;;  %v121_v25 = vshll.u32 %v112_v15, %v119_v22  ;;  %v124_v26 = vsub.s32 4294967266, %v119_v22 }
  0x64   :  { %v122_v27 = vshrl.u32 %v104_v20, %v120_v23  ;;  %v125_v28 = vadd.s32 127, %v124_v26 }
  0x66   :  { %v123_v29 = vor.u32 %v122_v27, %v121_v25  ;;  %v126_v30 = vshll.u32 %v125_v28, 23 }
  0x68   :  { %v127_v31 = vor.u32 4788187, %v126_v30  ;;  %v130_v32 = vcvt.s32.f32 %v123_v29 }
  0x6a   :  { %v128_v33 = vand.u32 2147483647, %v127_v31 }
  0x6c   :  { %v131_v34 = vmul.f32 %v130_v32, %v128_v33 }
  0x6e   :  { %v132_v36 = vxor.u32 2147483648, %v131_v34 }
  0x70   :  { %v133_v37 = vsel %vm50_vm7, %v132_v36, %v131_v34 }
  0x71   :  { %v136_v39 = vsel %vm49_vm8, %v257_v21, %v133_v37 }
  0x72   :  { %188 = vcosq.f32 %v136_v39 }
  0x73   :  { %190 = vsinq.f32 %v136_v39 }
  0x7f   :  { %v189_v43 = vpop.eup %188 }
  0x80   :  { %v191_v44 = vpop.eup %190  ;;  %v148_v45 = vxor.u32 2147483648, %v189_v43 }
  0x81   :  { %v145_v46 = vxor.u32 2147483648, %v191_v44 }
  0x82   :  { %v149_v24 = vsel %vm147_vm9, %v148_v45, %v191_v44 }
  0x83   :  { %v146_v47 = vsel %vm144_vm10, %v189_v43, %v145_v46 }
  0x84   :  { %v150_v49 = vsel %vm143_vm11, %v146_v47, %v149_v24 }
  0x85   :  { %v151_v50 = vsel %vm140_vm12, nan, %v150_v49 }
  0x86   :  { %v153_v51 = vadd.f32 %v152_v48, %v151_v50 }
  0x88   :  { %154 = vst [vmem:[#allocation5] sm:$0x3] %v153_v51 }
  0x89   :  { %223 = shalt.err (!%p220_p9)
}
  0x8a   :  { %164 = dma.vmem_to_hbm [thread:$0]  %s162_s11, 32, %s282_s1, [#allocation4]  }
  0x8b   :  { %234 = dma.done.wait [#allocation4], 32  }
  0x8c   :  { %235 = vsyncadd [#allocation4], 4294967264 }
  0x8d   :  { %168 = vsyncpa [#allocation3], 1 }
  0x8e   :  { %169 = vsyncpa [#allocation4], 1 }

</bundles_post_ra>
